<compile_context>
chip_gen: v5e
topology: v5e:2x2
jax: 0.10.0
libtpu: 0.0.40
codegen_flags: <defaults>
</compile_context>

<pallas_src>
import functools

import jax
import jax.numpy as jnp
from jax import lax
from jax.experimental import pallas as pl
from jax.experimental.pallas import tpu as pltpu


# In-kernel f32 temporaries (e scratch, x-m, inv, slack) relative to the f32
# size of one input tile.  Kept at ~2.5x (not ~4x) because the softmax `p` is
# never materialized -- the e*inv multiply is fused into the max fold.
_F32_TEMP_RATIO = 2.5


def _vmem_capacity_bytes():
    """Per-core VMEM capacity; conservative (v7x = 64 MiB) fallback."""
    try:
        cap = getattr(pltpu.get_tpu_info(), "vmem_capacity_bytes", None)
        if cap:
            return int(cap)
    except Exception:
        pass
    return 64 << 20


def _pick_tile_rows(C, R, Wk, itemsize, budget_bytes):
    """Rows per input tile: full R if it fits the budget, else the largest
    multiple of 8 within the budget (preferring one that divides R so no
    plain-JAX tail is needed)."""
    bytes_per_row = C * Wk * itemsize
    max_rows = budget_bytes // max(1, bytes_per_row)
    if R <= max_rows:
        return R                          # full extent -> always layout-legal
    max_tr = (min(R, max_rows) // 8) * 8
    if max_tr < 8:
        # TODO(synk): also tile the lane axis (multiples of 128) when a single
        # 8-row slab exceeds the budget (extremely wide C*W); floor at 8 rows.
        return 8
    lo = max(8, (max_tr // 2 // 8) * 8)
    for tr in range(max_tr, lo - 1, -8):  # prefer an exact divisor of R
        if R % tr == 0:
            return tr
    return max_tr


def _make_partial_kernel(approx_reciprocal, bf16_exp, tr, group):
    n_full = tr // group
    rem = tr - n_full * group

    def kernel(x_ref, o_ref, e_ref, inv_ref):
        # x_ref: (C, TR, Wk) block (batch / row-tile dims squeezed by BlockSpec).
        x = x_ref[...].astype(jnp.float32)

        # Numerically stable softmax over the channel axis (axis 0). Channel is
        # a major axis, so these reductions are elementwise VPU folds across C
        # vregs (no XLU work).
        m = jnp.max(x, axis=0, keepdims=True)              # (1, TR, Wk)
        xm = x - m
        if bf16_exp:
            # Optional bf16 transcendental path (v6e/v7x): ~2x EUP throughput;
            # pc precision drops to ~3 significant digits.
            e_ref[...] = jnp.exp(xm.astype(jnp.bfloat16)).astype(jnp.float32)
        else:
            e_ref[...] = jnp.exp(xm)                       # EUP
        s = jnp.sum(e_ref[...], axis=0, keepdims=True)     # (1, TR, Wk)
        # Hoisted reciprocal: one EUP op per pixel instead of C divides.
        inv_ref[...] = pl.reciprocal(s, approx=approx_reciprocal)

        def group_p(lo_idx):
            sl = pl.ds(lo_idx, group)
            return e_ref[:, sl, :] * inv_ref[:, sl, :]      # (C, group, Wk)

        # Sublane-group max fold: the output buffer itself is the accumulator,
        # so the full (C, TR, Wk) softmax is never materialized and the
        # cross-row reduce is a VPU max fold rather than an XLU reduce.
        o_ref[...] = group_p(0)

        def fold(lo_idx):
            o_ref[...] = jnp.maximum(o_ref[...], group_p(lo_idx))

        if n_full > 1:
            if n_full <= 16:               # short loop: unroll for LLO visibility
                for g in range(1, n_full):
                    fold(g * group)
            else:
                def body(g, carry):
                    fold(pl.multiple_of(g * group, group))
                    return carry
                lax.fori_loop(1, n_full, body, 0)

        if rem:                            # TR not a multiple of 8 (TR == R case)
            sl = pl.ds(n_full * group, rem)
            tail = jnp.max(e_ref[:, sl, :] * inv_ref[:, sl, :],
                           axis=1, keepdims=True)           # (C, 1, Wk) -- tiny
            o_ref[...] = jnp.maximum(o_ref[...], tail)

    return kernel


@functools.partial(jax.jit, static_argnames=("reduction", "delta",
                                             "approx_reciprocal", "bf16_exp",
                                             "tile_budget_bytes"))
def multi_class_loss(pred_sg_up, reduction="max", delta=2.3,
                     approx_reciprocal=True, bf16_exp=False,
                     tile_budget_bytes=None):
    """Pallas TPU implementation of MultiClassLoss.forward (reduction='max')."""
    if reduction != "max":
        # TODO(synk): 'mean' reduction path not implemented (default is 'max').
        raise NotImplementedError("only reduction='max' is implemented")

    N, C, H, W = pred_sg_up.shape
    itemsize = jnp.dtype(pred_sg_up.dtype).itemsize

    # Lane-dense spatial layout: the softmax is per-pixel and the spatial
    # reduction is a max, so flattening (H, W) -> (H*W/128, 128) preserves
    # semantics and is metadata-only (per-channel data is contiguous).  Avoids
    # padding every (8, W<128) row to a full (8, 128) vreg and keeps the
    # output store an unmasked full-width vst.
    if W % 128 == 0:
        R, Wk = H, W
        x_k = pred_sg_up
    elif (H * W) % 128 == 0:
        R, Wk = (H * W) // 128, 128
        x_k = pred_sg_up.reshape(N, C, R, Wk)
    else:
        # TODO(synk): lane-axis tiling / padding for W not dividing 128 at all;
        # this fallback wastes up to 128/W of VPU/EUP throughput.
        R, Wk = H, W
        x_k = pred_sg_up

    # Generation-aware sizing: per-core VMEM is 128 MiB on v5e/v6e but only
    # 64 MiB on v7x, so derive both the tile budget and vmem_limit_bytes from
    # the actual capacity, leaving headroom for Mosaic internal scratch.
    cap = _vmem_capacity_bytes()
    vmem_target = min(cap - (8 << 20), 64 << 20)
    if tile_budget_bytes is None:
        # 2x double-buffered input + ~2.5x f32 working set per input tile.
        per_input_byte = 2.0 + _F32_TEMP_RATIO * (4.0 / itemsize)
        tile_budget_bytes = int(max(1 << 20,
                                    (vmem_target - (6 << 20)) / per_input_byte))

    TR = _pick_tile_rows(C, R, Wk, itemsize, tile_budget_bytes)
    group = 8 if TR >= 8 else TR
    n_r = R // TR
    r_main = n_r * TR                      # rows covered by the kernel grid

    in_tile = C * TR * Wk * itemsize
    out_tile = C * group * Wk * 4
    f32_work = int(_F32_TEMP_RATIO * C * TR * Wk * 4)
    needed = 2 * in_tile + 2 * out_tile + f32_work + (6 << 20)
    vmem_limit = int(min(cap - (4 << 20), max(32 << 20, needed)))

    partials = pl.pallas_call(
        _make_partial_kernel(approx_reciprocal, bf16_exp, TR, group),
        out_shape=jax.ShapeDtypeStruct((N, n_r, C, group, Wk), jnp.float32),
        grid_spec=pltpu.PrefetchScalarGridSpec(
            num_scalar_prefetch=0,
            grid=(N, n_r),
            # Batch dim squeezed (None); block last two dims (TR, Wk) are
            # multiples of (8, 128) or the full array dims by construction.
            in_specs=[pl.BlockSpec((None, C, TR, Wk),
                                   lambda n, r: (n, 0, r, 0))],
            # Each step writes its own (C, group, Wk) partial-max block -> no
            # resident accumulator, both grid axes independent.
            out_specs=pl.BlockSpec((None, None, C, group, Wk),
                                   lambda n, r: (n, r, 0, 0, 0)),
            scratch_shapes=[pltpu.VMEM((C, TR, Wk), jnp.float32),   # e
                            pltpu.VMEM((1, TR, Wk), jnp.float32)],  # 1/sum
            # NOTE: only bump the input to pipeline_mode=pl.Buffered(3) if
            # xprof shows exposed DMA at step boundaries after the tile bump.
        ),
        compiler_params=pltpu.CompilerParams(
            # TODO(synk): on v7x, if xprof shows one idle TensorCore, mark the
            # leading axis pltpu.CORE_PARALLEL (or split N via pl.core_map).
            dimension_semantics=("parallel", "parallel"),
            vmem_limit_bytes=vmem_limit),
    )(x_k)

    # Tiny finalize in plain JAX: per-channel max over everything the kernel
    # produced (N * n_r * group * Wk elements per channel ~ input / (TR/8)).
    pc = jnp.max(partials, axis=(0, 1, 3, 4))               # (C,)

    # Rows not covered by the grid (R % TR != 0): at most TR-1 rows, handled
    # here in plain JAX -- negligible next to the kernel's HBM traffic.
    if r_main < R:
        x_tail = x_k[:, :, r_main:, :].astype(jnp.float32)
        p_tail = jax.nn.softmax(x_tail, axis=1)
        pc = jnp.maximum(pc, jnp.max(p_tail, axis=(0, 2, 3)))

    pc = pc / jnp.sum(pc)
    # NOTE: like the PyTorch module, this yields NaN if any pc underflows to
    # exactly 0; kept for parity (guard with jnp.where(pc > 0, ...) if wanted).
    loss = -jnp.sum(pc * jnp.log(pc))
    return jnp.minimum(loss, jnp.float32(delta))            # torch.clamp(max=delta)


def _reference(pred_sg_up, delta=2.3):
    """Pure-JAX reference mirroring the PyTorch forward (reduction='max')."""
    p = jax.nn.softmax(pred_sg_up.astype(jnp.float32), axis=1)
    pc = jnp.max(p, axis=(0, 2, 3))
    pc = pc / jnp.sum(pc)
    loss = -jnp.sum(pc * jnp.log(pc))
    return jnp.minimum(loss, delta)


if __name__ == "__main__":
    key = jax.random.PRNGKey(0)
    # Small shapes consistent with the module: (N, C, H, W) segmentation logits.
    x = jax.random.normal(key, (2, 4, 16, 16), dtype=jnp.float32)
    ref = _reference(x, delta=2.3)

    # Exact-reciprocal path: tight agreement with the reference.
    loss_exact = jax.block_until_ready(
        multi_class_loss(x, reduction="max", delta=2.3, approx_reciprocal=False))
    assert jnp.allclose(loss_exact, ref, atol=1e-5, rtol=1e-5), (loss_exact, ref)

    # Default fast path (EUP approx reciprocal).
    loss = jax.block_until_ready(multi_class_loss(x))
    assert jnp.allclose(loss, ref, atol=5e-3, rtol=5e-3), (loss, ref)

    # Multi-block grid path (forced small tile budget -> TR=8, 4 row-tiles).
    x2 = jax.random.normal(jax.random.PRNGKey(1), (2, 4, 64, 64), jnp.float32)
    loss2 = jax.block_until_ready(
        multi_class_loss(x2, tile_budget_bytes=4 * 8 * 128 * 4))
    assert jnp.allclose(loss2, _reference(x2), atol=5e-3, rtol=5e-3)

    # Odd shape: H*W not a multiple of 128, TR not a multiple of 8 (rem path).
    x3 = jax.random.normal(jax.random.PRNGKey(2), (1, 3, 17, 48), jnp.float32)
    loss3 = jax.block_until_ready(multi_class_loss(x3))
    assert jnp.allclose(loss3, _reference(x3), atol=5e-3, rtol=5e-3)

    # Larger row-tile exercising the fori_loop fold path (32 sublane groups).
    x4 = jax.random.normal(jax.random.PRNGKey(3), (1, 4, 256, 128), jnp.float32)
    loss4 = jax.block_until_ready(multi_class_loss(x4))
    assert jnp.allclose(loss4, _reference(x4), atol=5e-3, rtol=5e-3)

    # bf16 inputs (halves HBM traffic on v5e/v6e); kernel upcasts in-register.
    xb = x.astype(jnp.bfloat16)
    lossb = jax.block_until_ready(multi_class_loss(xb))
    assert jnp.allclose(lossb, _reference(xb), atol=5e-3, rtol=5e-3)

    # Optional bf16 transcendental path (v6e/v7x); looser tolerance.
    lossbe = jax.block_until_ready(multi_class_loss(x, bf16_exp=True))
    assert jnp.allclose(lossbe, ref, atol=5e-2, rtol=5e-2), (lossbe, ref)

    print("KERNEL_OK")
</pallas_src>

<mosaic_0001>
module attributes {stable_mosaic.version = 11 : i64} {
  func.func @kernel(%arg0: i32, %arg1: i32, %arg2: memref<1x4x2x128xf32, #tpu.memory_space<vmem>>, %arg3: memref<1x1x4x2x128xf32, #tpu.memory_space<vmem>>, %arg4: memref<4x2x128xf32, #tpu.memory_space<vmem>>, %arg5: memref<1x2x128xf32, #tpu.memory_space<vmem>>) attributes {dimension_semantics = [#tpu.dimension_semantics<parallel>, #tpu.dimension_semantics<parallel>], iteration_bounds = array<i64: 2, 1>, scalar_prefetch = 0 : i64, scratch_operands = 2 : i64, tpu.core_type = #tpu.core_type<tc>, window_params = [{transform_indices = @transform_0, window_bounds = array<i64: 1, 4, 2, 128>}, {transform_indices = @transform_1, window_bounds = array<i64: 1, 1, 4, 2, 128>}]} {
    %c0 = arith.constant 0 : index
    %c0_0 = arith.constant 0 : index
    %c0_1 = arith.constant 0 : index
    %c0_2 = arith.constant 0 : index
    %0 = vector.load %arg2[%c0, %c0_0, %c0_1, %c0_2] : memref<1x4x2x128xf32, #tpu.memory_space<vmem>>, vector<1x4x2x128xf32>
    %1 = vector.shape_cast %0 : vector<1x4x2x128xf32> to vector<4x2x128xf32>
    %cst = arith.constant dense<0xFF800000> : vector<2x128xf32>
    %2 = vector.multi_reduction <maximumf>, %1, %cst [0] : vector<4x2x128xf32> to vector<2x128xf32>
    %3 = vector.shape_cast %2 : vector<2x128xf32> to vector<1x2x128xf32>
    %4 = vector.broadcast %3 : vector<1x2x128xf32> to vector<4x2x128xf32>
    %5 = arith.subf %1, %4 : vector<4x2x128xf32>
    %6 = math.exp %5 : vector<4x2x128xf32>
    %c0_3 = arith.constant 0 : index
    %c0_4 = arith.constant 0 : index
    %c0_5 = arith.constant 0 : index
    %7 = vector.load %arg4[%c0_3, %c0_4, %c0_5] : memref<4x2x128xf32, #tpu.memory_space<vmem>>, vector<4x2x128xf32>
    tpu.vector_store %arg4[%c0_3, %c0_4, %c0_5], %6 {strides = array<i32>} : memref<4x2x128xf32, #tpu.memory_space<vmem>>, vector<4x2x128xf32>,
    %c0_6 = arith.constant 0 : index
    %c0_7 = arith.constant 0 : index
    %c0_8 = arith.constant 0 : index
    %8 = vector.load %arg4[%c0_6, %c0_7, %c0_8] : memref<4x2x128xf32, #tpu.memory_space<vmem>>, vector<4x2x128xf32>
    %cst_9 = arith.constant dense<0.000000e+00> : vector<2x128xf32>
    %9 = vector.multi_reduction <add>, %8, %cst_9 [0] : vector<4x2x128xf32> to vector<2x128xf32>
    %10 = vector.shape_cast %9 : vector<2x128xf32> to vector<1x2x128xf32>
    %11 = tpu.reciprocal %10 : vector<1x2x128xf32> -> vector<1x2x128xf32>
    %c0_10 = arith.constant 0 : index
    %c0_11 = arith.constant 0 : index
    %c0_12 = arith.constant 0 : index
    %12 = vector.load %arg5[%c0_10, %c0_11, %c0_12] : memref<1x2x128xf32, #tpu.memory_space<vmem>>, vector<1x2x128xf32>
    tpu.vector_store %arg5[%c0_10, %c0_11, %c0_12], %11 {strides = array<i32>} : memref<1x2x128xf32, #tpu.memory_space<vmem>>, vector<1x2x128xf32>,
    %c0_13 = arith.constant 0 : index
    %c0_14 = arith.constant 0 : index
    %c0_15 = arith.constant 0 : index
    %13 = vector.load %arg4[%c0_13, %c0_14, %c0_15] : memref<4x2x128xf32, #tpu.memory_space<vmem>>, vector<4x2x128xf32>
    %c0_16 = arith.constant 0 : index
    %c0_17 = arith.constant 0 : index
    %c0_18 = arith.constant 0 : index
    %14 = vector.load %arg5[%c0_16, %c0_17, %c0_18] : memref<1x2x128xf32, #tpu.memory_space<vmem>>, vector<1x2x128xf32>
    %15 = vector.broadcast %14 : vector<1x2x128xf32> to vector<4x2x128xf32>
    %16 = arith.mulf %13, %15 : vector<4x2x128xf32>
    %c0_19 = arith.constant 0 : index
    %c0_20 = arith.constant 0 : index
    %c0_21 = arith.constant 0 : index
    %c0_22 = arith.constant 0 : index
    %c0_23 = arith.constant 0 : index
    %17 = vector.load %arg3[%c0_19, %c0_20, %c0_21, %c0_22, %c0_23] : memref<1x1x4x2x128xf32, #tpu.memory_space<vmem>>, vector<1x1x4x2x128xf32>
    %18 = vector.shape_cast %17 : vector<1x1x4x2x128xf32> to vector<4x2x128xf32>
    %19 = vector.shape_cast %16 : vector<4x2x128xf32> to vector<1x1x4x2x128xf32>
    tpu.vector_store %arg3[%c0_19, %c0_20, %c0_21, %c0_22, %c0_23], %19 {strides = array<i32>} : memref<1x1x4x2x128xf32, #tpu.memory_space<vmem>>, vector<1x1x4x2x128xf32>,
    return
  }
  func.func @transform_0(%arg0: i32, %arg1: i32) -> (i32, i32, i32, i32) {
    %c0_i32 = arith.constant 0 : i32
    %c0_i32_0 = arith.constant 0 : i32
    %c0_i32_1 = arith.constant 0 : i32
    return %arg0, %c0_i32, %arg1, %c0_i32_0 : i32, i32, i32, i32
  }
  func.func @transform_1(%arg0: i32, %arg1: i32) -> (i32, i32, i32, i32, i32) {
    %c0_i32 = arith.constant 0 : i32
    %c0_i32_0 = arith.constant 0 : i32
    %c0_i32_1 = arith.constant 0 : i32
    %c0_i32_2 = arith.constant 0 : i32
    return %arg0, %arg1, %c0_i32, %c0_i32_0, %c0_i32_1 : i32, i32, i32, i32, i32
  }
}

</mosaic_0001>

<bundles_post_ra>
// kernel: multi_class_loss.1
= control target key start
LH: loop header
LB: loop body
LE: loop exit
PB: predicated region body
PF: predicated region fallthrough
CT: control target
= control target key end

     0   :  { %s387_s6 = smov 0   ;;  %s389_s7 = smov 0   ;;  %s435_s0 = inlined_call_operand.vmem [shape: f32[2,4,2,128], index: 0, kind: input, shape index: {}]   ;;  %s436_s1 = inlined_call_operand.vmem [shape: f32[2,1,4,2,128], index: 1, kind: output, shape index: {}]  }
   0x1   :  { %s391_s8 = smov 0  }
   0x2 LB: > { %s23_s9 = sadd.s32 1, %s371_s7  ;;  %p310_p0 = scmp.ge.s32.totalorder %s375_s8, 1  ;;  %s375_s8 = sphi %s391_s8, %s11_s8   ;;  %s371_s7 = sphi %s389_s7, %s438_s7   ;;  %s367_s6 = sphi %s387_s6, %s437_s6  }
   0x3   : > { %p25_p1 = scmp.ge.s32.totalorder %s23_s9, 2  ;;  %p106_p2 = scmp.lt.s32.totalorder %s375_s8, 3 }
   0x5   : > { %s440_s9 = smov (%p25_p1, %s23_s9), 0  ;;  %p107_p3 = pnand %p310_p0, %p106_p2 }
   0x6   : > { %p133_p4 = scmp.lt.s32.totalorder (!%p107_p3), %s367_s6, 1 }
   0x7   : > { %110 = sbr.rel (%p107_p3) target bundleno = 80 (0x50), region = 24 }
   0xc   : > { %s442_s6 = smov (!%p133_p4, %s367_s6), 1  ;;  %vm154_vm0 = vcmask 1041408  }
   0xd   : > { %s317_s10 = sshll.u32 %s442_s6, 3 }
   0xe   : > { %s140_s13 = scalar_lea.vmem %s435_s0, %s317_s10  ;;  %s149_s16 = scalar_lea.vmem %s436_s1, %s317_s10 }
   0xf   : > { %v150_v0 = vld [vmem:[%s140_s13] sm:$0x3]  ;;  %v151_v1 = vld [vmem:[%s140_s13 + $0x2] sm:$0x3]  ;;  %v152_v2 = vld [vmem:[%s140_s13 + $0x4] sm:$0x3] }
  0x10   : > { %v153_v3 = vld [vmem:[%s140_s13 + $0x6] sm:$0x3]  ;;  %v155_v4 = vsel %vm154_vm0, %v150_v0, -inf  ;;  %v156_v5 = vsel %vm154_vm0, %v151_v1, -inf  ;;  %v157_v6 = vsel %vm154_vm0, %v152_v2, -inf }
  0x11   : > { %v158_v7 = vsel %vm154_vm0, %v153_v3, -inf  ;;  %v159_v8 = vmax.f32 %v155_v4, %v156_v5 }
  0x12   : > { %v160_v9 = vmax.f32 %v157_v6, %v158_v7 }
  0x14   : > { %v161_v10 = vmax.f32 %v159_v8, %v160_v9 }
  0x16   : > { %v162_v11 = vsub.f32 %v150_v0, %v161_v10  ;;  %v163_v12 = vsub.f32 %v151_v1, %v161_v10  ;;  %v164_v13 = vsub.f32 %v152_v2, %v161_v10  ;;  %v165_v14 = vsub.f32 %v153_v3, %v161_v10 }
  0x18   : > { %v166_v15 = vmul.f32 1.442695, %v162_v11  ;;  %v168_v16 = vmul.f32 1.442695, %v163_v12  ;;  %v170_v17 = vmul.f32 1.442695, %v164_v13 }
  0x19   : > { %v172_v18 = vmul.f32 1.442695, %v165_v14 }
  0x1a   : > { %343 = vpow2.f32 %v166_v15 }
  0x1b   : > { %345 = vpow2.f32 %v168_v16 }
  0x1c   : > { %347 = vpow2.f32 %v170_v17 }
  0x1d   : > { %349 = vpow2.f32 %v172_v18 }
  0x20   : > { %v344_v19 = vpop.eup %343 }
  0x21   : > { %v346_v20 = vpop.eup %345  ;;  %174 = vst [vmem:[#allocation2] sm:$0x3] %v344_v19 }
  0x22   : > { %v348_v21 = vpop.eup %347  ;;  %175 = vst [vmem:[#allocation2 + $0x2] sm:$0x3] %v346_v20 }
  0x23   : > { %v350_v22 = vpop.eup %349  ;;  %176 = vst [vmem:[#allocation2 + $0x4] sm:$0x3] %v348_v21 }
  0x24   : > { %177 = vst [vmem:[#allocation2 + $0x6] sm:$0x3] %v350_v22 }
  0x28   : > { %v178_v23 = vld [vmem:[#allocation2] sm:$0x3] }
  0x29   : > { %v179_v24 = vld [vmem:[#allocation2 + $0x2] sm:$0x3]  ;;  %v182_v25 = vsel %vm154_vm0, %v178_v23, 0.0  ;;  %v204_v44 = vld [vmem:[#allocation2] sm:$0x3] }
  0x2a   : > { %v180_v26 = vld [vmem:[#allocation2 + $0x4] sm:$0x3]  ;;  %v183_v27 = vsel %vm154_vm0, %v179_v24, 0.0  ;;  %v205_v46 = vld [vmem:[#allocation2 + $0x2] sm:$0x3] }
  0x2b   : > { %v181_v28 = vld [vmem:[#allocation2 + $0x6] sm:$0x3]  ;;  %v184_v29 = vadd.f32 %v183_v27, %v182_v25  ;;  %v185_v30 = vsel %vm154_vm0, %v180_v26, 0.0  ;;  %v206_v47 = vld [vmem:[#allocation2 + $0x4] sm:$0x3] }
  0x2c   : > { %v187_v31 = vsel %vm154_vm0, %v181_v28, 0.0  ;;  %v207_v51 = vld [vmem:[#allocation2 + $0x6] sm:$0x3] }
  0x2d   : > { %v186_v32 = vadd.f32 %v185_v30, %v184_v29 }
  0x2f   : > { %v188_v33 = vadd.f32 %v187_v31, %v186_v32 }
  0x31   : > { %351 = vrcp.f32 %v188_v33  ;;  %v200_v37 = vand.u32 2147483648, %v188_v33  ;;  %v198_v39 = vand.u32 2147483647, %v188_v33  ;;  %vm194_vm2 = vweird.f32 %v188_v33 }
  0x33   : > { %v201_v41 = vor.u32 1.1754944e-38, %v200_v37  ;;  %vm199_vm4 = vcmp.eq.f32.partialorder %v198_v39, 8.507059e+37 }
  0x37   : > { %v352_v34 = vpop.eup %351 }
  0x38   : > { %v190_v35 = vmul.f32 %v352_v34, %v188_v33  ;;  %vm195_vm1 = vweird.f32 %v352_v34 }
  0x39   : > { %vm196_vm3 = vmor %vm194_vm2, %vm195_vm1 }
  0x3a   : > { %v191_v36 = vsub.f32 1.0, %v190_v35 }
  0x3c   : > { %v192_v38 = vmul.f32 %v352_v34, %v191_v36 }
  0x3e   : > { %v193_v40 = vadd.f32 %v352_v34, %v192_v38 }
  0x40   : > { %v197_v42 = vsel %vm196_vm3, %v352_v34, %v193_v40 }
  0x41   : > { %v202_v43 = vsel %vm199_vm4, %v201_v41, %v197_v42 }
  0x42   : > { %203 = vst [vmem:[#allocation3] sm:$0x3] %v202_v43 }
  0x49   : > { %v208_v45 = vld [vmem:[#allocation3] sm:$0x3] }
  0x4a   : > { %v209_v48 = vmul.f32 %v208_v45, %v204_v44  ;;  %v210_v49 = vmul.f32 %v208_v45, %v205_v46  ;;  %v211_v50 = vmul.f32 %v208_v45, %v206_v47  ;;  %v212_v52 = vmul.f32 %v208_v45, %v207_v51 }
  0x4c   : > { %213 = vst [vmem:[%s149_s16] sm:$0x3] %v209_v48 }
  0x4d   : > { %214 = vst [vmem:[%s149_s16 + $0x2] sm:$0x3] %v210_v49 }
  0x4e   : > { %215 = vst [vmem:[%s149_s16 + $0x4] sm:$0x3] %v211_v50 }
  0x4f   : > { %216 = vst [vmem:[%s149_s16 + $0x6] sm:$0x3] %v212_v52 }
  0x50 PF: > { %s11_s8 = sadd.s32 1, %s375_s8   ;;  %s437_s6 = smov %s371_s7 }
  0x51   : > { %p8_p5 = scmp.ge.s32.totalorder %s11_s8, 4   ;;  %s438_s7 = smov %s440_s9 }
  0x53   :  { %10 = sbr.rel (!%p8_p5) target bundleno = 2 (0x2), region = 54 }

</bundles_post_ra>
